<compile_context>
chip_gen: v7x
topology: tpu7x:2x2x1
jax: 0.10.0
libtpu: 0.0.40
codegen_flags: <defaults>
</compile_context>

<pallas_src>
import math
from functools import partial

import jax
import jax.numpy as jnp
from jax.experimental import pallas as pl
from jax.experimental.pallas import tpu as pltpu


# ---------------------------------------------------------------------------
# Main fused kernel: one batch tile (TB, D) per grid step.
# ---------------------------------------------------------------------------
def _make_main_kernel(warmup: bool):
    def kernel(*refs):
        if warmup:
            (feat_ref, proto_ref, clsw_ref, labels_ref,
             cost_ref, nearest_ref, softmax_ref, qloss_ref, ploss_ref) = refs
        else:
            feat_ref, proto_ref, cost_ref, nearest_ref, softmax_ref = refs

        feat = feat_ref[...]                        # (TB, D) f32
        proto = proto_ref[...]                      # (N, D)  f32
        TB = feat.shape[0]
        N, D = proto.shape

        # --- single MXU pass: predicted_prototype logits = feat @ proto^T ----
        pred = jax.lax.dot_general(
            feat.astype(jnp.bfloat16), proto.astype(jnp.bfloat16),
            (((1,), (1,)), ((), ())),
            preferred_element_type=jnp.float32)      # (TB, N) f32

        # --- cosine cost derived from the same matmul by rank-1 rsqrt scaling
        inv_f = jax.lax.rsqrt(
            jnp.sum(feat * feat, axis=1, keepdims=True) + 1e-24)          # (TB, 1)
        # Prototype squared norms produced directly in lane (row-vector)
        # orientation via a tiny ones-row matmul -> no sublane->lane relayout.
        psq = jax.lax.dot_general(
            jnp.ones((1, D), jnp.float32), proto * proto,
            (((1,), (1,)), ((), ())),
            preferred_element_type=jnp.float32)      # (1, N)
        inv_p = jax.lax.rsqrt(psq + 1e-24)

        cost = 1.0 - pred * inv_f * inv_p            # (TB, N) f32
        cost_ref[...] = cost

        # --- nearest prototype = argmin over N (first index on ties, f32 cmp)
        col = jax.lax.broadcasted_iota(jnp.int32, (TB, N), 1)
        min_val = jnp.min(cost, axis=1, keepdims=True)
        nearest = jnp.min(jnp.where(cost == min_val, col, N), axis=1,
                          keepdims=True)
        nearest_ref[...] = nearest                   # (TB, 1) int32

        # --- softmax(predicted_prototype)  (EUP exp + approx reciprocal) -----
        m2 = jnp.max(pred, axis=1, keepdims=True)
        e2 = jnp.exp(pred - m2)
        s2 = jnp.sum(e2, axis=1, keepdims=True)
        softmax_ref[...] = e2 * pl.reciprocal(s2, approx=True)

        if warmup:
            i = pl.program_id(0)

            @pl.when(i == 0)
            def _():
                qloss_ref[...] = jnp.zeros_like(qloss_ref)
                ploss_ref[...] = jnp.zeros_like(ploss_ref)

            clsw = clsw_ref[...]                     # (C, D) f32
            labels = labels_ref[...]                 # (TB, 1) int32
            C = clsw.shape[0]

            onehot_n = (col == nearest).astype(jnp.float32)               # (TB, N)

            # quantized_logits = prototype[nearest] @ W^T = onehot @ (proto @ W^T)
            proto_logits = jax.lax.dot_general(
                proto.astype(jnp.bfloat16), clsw.astype(jnp.bfloat16),
                (((1,), (1,)), ((), ())),
                preferred_element_type=jnp.float32)                        # (N, C)
            quant_logits = jnp.dot(onehot_n, proto_logits,
                                   preferred_element_type=jnp.float32)     # (TB, C)

            # quantized cross-entropy (sum over tile; wrapper divides by B)
            c_idx = jax.lax.broadcasted_iota(jnp.int32, (TB, C), 1)
            onehot_c = (c_idx == labels).astype(jnp.float32)
            mq = jnp.max(quant_logits, axis=1, keepdims=True)
            lse_q = mq + jnp.log(jnp.sum(jnp.exp(quant_logits - mq),
                                         axis=1, keepdims=True))
            picked_q = jnp.sum(onehot_c * quant_logits, axis=1, keepdims=True)
            qloss_ref[...] += jnp.sum(lse_q - picked_q, axis=0, keepdims=True)

            # prototype cross-entropy vs nearest, on the unnormalized pred logits
            lse_p = m2 + jnp.log(s2)
            picked_p = jnp.sum(onehot_n * pred, axis=1, keepdims=True)
            ploss_ref[...] += jnp.sum(lse_p - picked_p, axis=0, keepdims=True)

    return kernel


# ---------------------------------------------------------------------------
# Log-domain Sinkhorn kernel (approximation of ot.emd2), fully in VMEM.
# ---------------------------------------------------------------------------
def _make_sinkhorn_kernel(reg: float, n_iters: int):
    inv_reg = 1.0 / reg

    def kernel(cost_ref, b_ref, out_ref):
        M = cost_ref[...]                            # (B, N) f32
        B = M.shape[0]
        N = M.shape[1]
        Mr = M * inv_reg                             # precompute M / reg once
        log_b = jnp.log(b_ref[...])                  # (1, N)
        log_a = jnp.full((B, 1), -math.log(B), jnp.float32)   # uniform 1/B

        f0 = jnp.zeros((B, 1), jnp.float32)
        g0 = jnp.zeros((1, N), jnp.float32)

        def body(_, carry):
            f, g = carry
            # f_i = reg * (log a_i - logsumexp_j((g_j - M_ij)/reg))
            t = g * inv_reg - Mr                                   # (B, N)
            m = jnp.max(t, axis=1, keepdims=True)
            lse = m + jnp.log(jnp.sum(jnp.exp(t - m), axis=1, keepdims=True))
            f = reg * (log_a - lse)
            # g_j = reg * (log b_j - logsumexp_i((f_i - M_ij)/reg))
            t2 = f * inv_reg - Mr                                  # (B, N)
            m2 = jnp.max(t2, axis=0, keepdims=True)
            lse2 = m2 + jnp.log(jnp.sum(jnp.exp(t2 - m2), axis=0, keepdims=True))
            g = reg * (log_b - lse2)
            return f, g

        f, g = jax.lax.fori_loop(0, n_iters, body, (f0, g0))
        P = jnp.exp((f + g) * inv_reg - Mr)                        # transport plan
        pm = jnp.sum(P * M, axis=1, keepdims=True)                 # (B, 1)
        out_ref[...] = jnp.sum(pm, axis=0, keepdims=True)          # (1, 1)

    return kernel


# ---------------------------------------------------------------------------
# Wrapper
# ---------------------------------------------------------------------------
def _pick_tile_b(B: int, D: int) -> int:
    # Bound the (TB, D) f32 feature block so the double-buffered pipeline fits
    # comfortably in scoped VMEM on every generation (v7x has only 64 MiB phys).
    budget_bytes = 4 * 1024 * 1024
    for tb in (1024, 512, 256, 128):
        if B % tb == 0 and tb * D * 4 <= budget_bytes:
            return tb
    return B


def prototype_forward(features, labels, classifier_weight, prototype,
                      prototype_weight, lambda_ot=0.1, n_domains=3,
                      warmup_finished=False, reg=0.05, n_sinkhorn_iters=200):
    B, D = features.shape
    N = prototype.shape[0]
    C = classifier_weight.shape[0]
    TB = _pick_tile_b(B, D)
    G = B // TB

    feat_spec = pl.BlockSpec((TB, D), lambda i: (i, 0))
    proto_spec = pl.BlockSpec((N, D), lambda i: (0, 0))       # resident
    cost_spec = pl.BlockSpec((TB, N), lambda i: (i, 0))
    nearest_spec = pl.BlockSpec((TB, 1), lambda i: (i, 0))
    softmax_spec = pl.BlockSpec((TB, N), lambda i: (i, 0))
    vmem = pl.BlockSpec(memory_space=pltpu.MemorySpace.VMEM)

    if warmup_finished:
        clsw_spec = pl.BlockSpec((C, D), lambda i: (0, 0))    # resident
        labels_spec = pl.BlockSpec((TB, 1), lambda i: (i, 0))
        scalar_spec = pl.BlockSpec((1, 1), lambda i: (0, 0))  # resident accumulator
        labels2d = labels.astype(jnp.int32).reshape(B, 1)
        cost, nearest, sm, qsum, psum = pl.pallas_call(
            _make_main_kernel(True),
            grid=(G,),
            out_shape=(
                jax.ShapeDtypeStruct((B, N), jnp.float32),    # cosine cost matrix
                jax.ShapeDtypeStruct((B, 1), jnp.int32),      # nearest subspace
                jax.ShapeDtypeStruct((B, N), jnp.float32),    # softmax(pred logits)
                jax.ShapeDtypeStruct((1, 1), jnp.float32),    # sum quantized CE
                jax.ShapeDtypeStruct((1, 1), jnp.float32),    # sum prototype CE
            ),
            in_specs=[feat_spec, proto_spec, clsw_spec, labels_spec],
            out_specs=(cost_spec, nearest_spec, softmax_spec,
                       scalar_spec, scalar_spec),
            compiler_params=pltpu.CompilerParams(
                dimension_semantics=("arbitrary",)),          # loss accumulation
        )(features, prototype, classifier_weight, labels2d)
    else:
        cost, nearest, sm = pl.pallas_call(
            _make_main_kernel(False),
            grid=(G,),
            out_shape=(
                jax.ShapeDtypeStruct((B, N), jnp.float32),
                jax.ShapeDtypeStruct((B, 1), jnp.int32),
                jax.ShapeDtypeStruct((B, N), jnp.float32),
            ),
            in_specs=[feat_spec, proto_spec],
            out_specs=(cost_spec, nearest_spec, softmax_spec),
            compiler_params=pltpu.CompilerParams(
                dimension_semantics=("parallel",)),           # megacore-friendly
        )(features, prototype)

    # Entropic OT (log-domain Sinkhorn) on the cost matrix, fully in-kernel:
    # no host-level iteration, cost/K never re-materialized per step.
    ot = pl.pallas_call(
        _make_sinkhorn_kernel(reg, n_sinkhorn_iters),
        out_shape=jax.ShapeDtypeStruct((1, 1), jnp.float32),
        in_specs=[vmem, vmem],
        out_specs=vmem,
    )(cost, prototype_weight.reshape(1, N).astype(jnp.float32))

    loss = ot[0, 0]
    if warmup_finished:   # matches self.warmup_finised (default False)
        loss = loss + lambda_ot * (psum[0, 0] / B) / n_domains \
                    + lambda_ot * (qsum[0, 0] / B) / n_domains
    return loss, nearest[:, 0], sm


prototype_forward_jit = jax.jit(
    prototype_forward,
    static_argnames=("warmup_finished", "reg", "n_sinkhorn_iters"))


if __name__ == "__main__":
    # Small synthetic config: num_embed=16, n_classes=8, n_domains=3,
    # feature_dim=128, batch=8.
    B, D, N, C, n_domains = 8, 128, 16, 8, 3
    key = jax.random.PRNGKey(0)
    k1, k2, k3, k4 = jax.random.split(key, 4)

    features = jax.random.normal(k1, (B, D), jnp.float32)
    labels = jax.random.randint(k2, (B,), 0, C)
    classifier_weight = 0.01 * jax.random.normal(k3, (C, D), jnp.float32)
    # prototype.data.uniform_(-1/num_embed, 1/num_embed)
    prototype = jax.random.uniform(k4, (N, D), jnp.float32,
                                   minval=-1.0 / N, maxval=1.0 / N)
    prototype_weight = jnp.ones((N,), jnp.float32) / N

    # Default path (warmup not finished): only the OT projection loss.
    loss, nearest, softmax_pred = prototype_forward_jit(
        features, labels, classifier_weight, prototype, prototype_weight,
        lambda_ot=0.1, n_domains=n_domains, warmup_finished=False)
    jax.block_until_ready((loss, nearest, softmax_pred))

    # Post-warmup path: adds the quantized / prototype cross-entropy terms.
    loss_w, nearest_w, softmax_w = prototype_forward_jit(
        features, labels, classifier_weight, prototype, prototype_weight,
        lambda_ot=0.1, n_domains=n_domains, warmup_finished=True)
    jax.block_until_ready((loss_w, nearest_w, softmax_w))

    assert nearest.shape == (B,) and softmax_pred.shape == (B, N)
    assert bool(jnp.isfinite(loss)) and bool(jnp.isfinite(loss_w))
    print("KERNEL_OK")
</pallas_src>

<mosaic_0001>
module attributes {stable_mosaic.version = 11 : i64} {
  func.func @kernel(%arg0: i32, %arg1: memref<8x128xf32, #tpu.memory_space<vmem>>, %arg2: memref<16x128xf32, #tpu.memory_space<vmem>>, %arg3: memref<8x16xf32, #tpu.memory_space<vmem>>, %arg4: memref<8x1xi32, #tpu.memory_space<vmem>>, %arg5: memref<8x16xf32, #tpu.memory_space<vmem>>) attributes {dimension_semantics = [#tpu.dimension_semantics<parallel>], iteration_bounds = array<i64: 1>, scalar_prefetch = 0 : i64, scratch_operands = 0 : i64, tpu.core_type = #tpu.core_type<tc>, window_params = [{transform_indices = @transform_0, window_bounds = array<i64: 8, 128>}, {pipeline_mode = #tpu.pipeline_mode<synchronous>, transform_indices = @transform_1, window_bounds = array<i64: 16, 128>}, {transform_indices = @transform_2, window_bounds = array<i64: 8, 16>}, {transform_indices = @transform_3, window_bounds = array<i64: 8, 1>}, {transform_indices = @transform_4, window_bounds = array<i64: 8, 16>}]} {
    %c0 = arith.constant 0 : index
    %c0_0 = arith.constant 0 : index
    %0 = vector.load %arg1[%c0, %c0_0] : memref<8x128xf32, #tpu.memory_space<vmem>>, vector<8x128xf32>
    %c0_1 = arith.constant 0 : index
    %c0_2 = arith.constant 0 : index
    %1 = vector.load %arg2[%c0_1, %c0_2] : memref<16x128xf32, #tpu.memory_space<vmem>>, vector<16x128xf32>
    %2 = arith.truncf %0 : vector<8x128xf32> to vector<8x128xbf16>
    %3 = arith.truncf %1 : vector<16x128xf32> to vector<16x128xbf16>
    %cst = arith.constant dense<0.000000e+00> : vector<8x16xf32>
    %4 = tpu.matmul %2, %3, %cst {dimension_numbers = #tpu.dot_dimension_numbers<[1], [1], [0], [0], [0, 0, 1, 0], [], []>} : vector<8x128xbf16>, vector<16x128xbf16>, vector<8x16xf32> -> vector<8x16xf32>
    %5 = arith.mulf %0, %0 : vector<8x128xf32>
    %cst_3 = arith.constant dense<0.000000e+00> : vector<8xf32>
    %6 = vector.multi_reduction <add>, %5, %cst_3 [1] : vector<8x128xf32> to vector<8xf32>
    %7 = vector.shape_cast %6 : vector<8xf32> to vector<8x1xf32>
    %cst_4 = arith.constant 1.000000e-24 : f32
    %8 = vector.broadcast %cst_4 : f32 to vector<8x1xf32>
    %9 = arith.addf %7, %8 : vector<8x1xf32>
    %10 = math.rsqrt %9 : vector<8x1xf32>
    %cst_5 = arith.constant 1.000000e+00 : f32
    %11 = vector.broadcast %cst_5 : f32 to vector<1x128xf32>
    %12 = arith.mulf %1, %1 : vector<16x128xf32>
    %cst_6 = arith.constant dense<0.000000e+00> : vector<1x16xf32>
    %13 = tpu.matmul %11, %12, %cst_6 {dimension_numbers = #tpu.dot_dimension_numbers<[1], [1], [0], [0], [0, 0, 1, 0], [], []>} : vector<1x128xf32>, vector<16x128xf32>, vector<1x16xf32> -> vector<1x16xf32>
    %cst_7 = arith.constant 1.000000e-24 : f32
    %14 = vector.broadcast %cst_7 : f32 to vector<1x16xf32>
    %15 = arith.addf %13, %14 : vector<1x16xf32>
    %16 = math.rsqrt %15 : vector<1x16xf32>
    %17 = vector.broadcast %10 : vector<8x1xf32> to vector<8x16xf32>
    %18 = arith.mulf %4, %17 : vector<8x16xf32>
    %19 = vector.broadcast %16 : vector<1x16xf32> to vector<8x16xf32>
    %20 = arith.mulf %18, %19 : vector<8x16xf32>
    %cst_8 = arith.constant 1.000000e+00 : f32
    %21 = vector.broadcast %cst_8 : f32 to vector<8x16xf32>
    %22 = arith.subf %21, %20 : vector<8x16xf32>
    %c0_9 = arith.constant 0 : index
    %c0_10 = arith.constant 0 : index
    %23 = vector.load %arg3[%c0_9, %c0_10] : memref<8x16xf32, #tpu.memory_space<vmem>>, vector<8x16xf32>
    tpu.vector_store %arg3[%c0_9, %c0_10], %22 {strides = array<i32>} : memref<8x16xf32, #tpu.memory_space<vmem>>, vector<8x16xf32>,
    %24 = tpu.iota {dimensions = array<i32: 1>} : vector<8x16xi32>
    %cst_11 = arith.constant dense<0x7F800000> : vector<8xf32>
    %25 = vector.multi_reduction <minimumf>, %22, %cst_11 [1] : vector<8x16xf32> to vector<8xf32>
    %26 = vector.shape_cast %25 : vector<8xf32> to vector<8x1xf32>
    %27 = vector.broadcast %26 : vector<8x1xf32> to vector<8x16xf32>
    %28 = arith.cmpf oeq, %22, %27 : vector<8x16xf32>
    %c16_i32 = arith.constant 16 : i32
    %29 = vector.broadcast %c16_i32 : i32 to vector<8x16xi32>
    %30 = arith.select %28, %24, %29 : vector<8x16xi1>, vector<8x16xi32>
    %cst_12 = arith.constant dense<2147483647> : vector<8xi32>
    %31 = vector.multi_reduction <minsi>, %30, %cst_12 [1] : vector<8x16xi32> to vector<8xi32>
    %32 = vector.shape_cast %31 : vector<8xi32> to vector<8x1xi32>
    %c0_13 = arith.constant 0 : index
    %c0_14 = arith.constant 0 : index
    %33 = vector.load %arg4[%c0_13, %c0_14] : memref<8x1xi32, #tpu.memory_space<vmem>>, vector<8x1xi32>
    tpu.vector_store %arg4[%c0_13, %c0_14], %32 {strides = array<i32>} : memref<8x1xi32, #tpu.memory_space<vmem>>, vector<8x1xi32>,
    %cst_15 = arith.constant dense<0xFF800000> : vector<8xf32>
    %34 = vector.multi_reduction <maximumf>, %4, %cst_15 [1] : vector<8x16xf32> to vector<8xf32>
    %35 = vector.shape_cast %34 : vector<8xf32> to vector<8x1xf32>
    %36 = vector.broadcast %35 : vector<8x1xf32> to vector<8x16xf32>
    %37 = arith.subf %4, %36 : vector<8x16xf32>
    %38 = math.exp %37 : vector<8x16xf32>
    %cst_16 = arith.constant dense<0.000000e+00> : vector<8xf32>
    %39 = vector.multi_reduction <add>, %38, %cst_16 [1] : vector<8x16xf32> to vector<8xf32>
    %40 = vector.shape_cast %39 : vector<8xf32> to vector<8x1xf32>
    %41 = tpu.reciprocal %40 {approx = true} : vector<8x1xf32> -> vector<8x1xf32>
    %42 = vector.broadcast %41 : vector<8x1xf32> to vector<8x16xf32>
    %43 = arith.mulf %38, %42 : vector<8x16xf32>
    %c0_17 = arith.constant 0 : index
    %c0_18 = arith.constant 0 : index
    %44 = vector.load %arg5[%c0_17, %c0_18] : memref<8x16xf32, #tpu.memory_space<vmem>>, vector<8x16xf32>
    tpu.vector_store %arg5[%c0_17, %c0_18], %43 {strides = array<i32>} : memref<8x16xf32, #tpu.memory_space<vmem>>, vector<8x16xf32>,
    return
  }
  func.func @transform_0(%arg0: i32) -> (i32, i32) {
    %c0_i32 = arith.constant 0 : i32
    %c0_i32_0 = arith.constant 0 : i32
    return %arg0, %c0_i32 : i32, i32
  }
  func.func @transform_1(%arg0: i32) -> (i32, i32) {
    %c0_i32 = arith.constant 0 : i32
    %c0_i32_0 = arith.constant 0 : i32
    %c0_i32_1 = arith.constant 0 : i32
    return %c0_i32, %c0_i32_0 : i32, i32
  }
  func.func @transform_2(%arg0: i32) -> (i32, i32) {
    %c0_i32 = arith.constant 0 : i32
    %c0_i32_0 = arith.constant 0 : i32
    return %arg0, %c0_i32 : i32, i32
  }
  func.func @transform_3(%arg0: i32) -> (i32, i32) {
    %c0_i32 = arith.constant 0 : i32
    %c0_i32_0 = arith.constant 0 : i32
    return %arg0, %c0_i32 : i32, i32
  }
  func.func @transform_4(%arg0: i32) -> (i32, i32) {
    %c0_i32 = arith.constant 0 : i32
    %c0_i32_0 = arith.constant 0 : i32
    return %arg0, %c0_i32 : i32, i32
  }
}

module attributes {stable_mosaic.version = 11 : i64} {
  func.func @kernel(%arg0: memref<8x16xf32, #tpu.memory_space<vmem>>, %arg1: memref<1x16xf32, #tpu.memory_space<vmem>>, %arg2: memref<1x1xf32, #tpu.memory_space<vmem>>) attributes {dimension_semantics = [], scalar_prefetch = 0 : i64, scratch_operands = 0 : i64, tpu.core_type = #tpu.core_type<tc>} {
    %c0 = arith.constant 0 : index
    %c0_0 = arith.constant 0 : index
    %0 = vector.load %arg0[%c0, %c0_0] : memref<8x16xf32, #tpu.memory_space<vmem>>, vector<8x16xf32>
    %cst = arith.constant 2.000000e+01 : f32
    %1 = vector.broadcast %cst : f32 to vector<8x16xf32>
    %2 = arith.mulf %0, %1 : vector<8x16xf32>
    %c0_1 = arith.constant 0 : index
    %c0_2 = arith.constant 0 : index
    %3 = vector.load %arg1[%c0_1, %c0_2] : memref<1x16xf32, #tpu.memory_space<vmem>>, vector<1x16xf32>
    %4 = math.log %3 : vector<1x16xf32>
    %cst_3 = arith.constant -2.07944155 : f32
    %5 = vector.broadcast %cst_3 : f32 to vector<8x1xf32>
    %cst_4 = arith.constant 0.000000e+00 : f32
    %6 = vector.broadcast %cst_4 : f32 to vector<8x1xf32>
    %cst_5 = arith.constant 0.000000e+00 : f32
    %7 = vector.broadcast %cst_5 : f32 to vector<1x16xf32>
    %c0_i32 = arith.constant 0 : i32
    %c200_i32 = arith.constant 200 : i32
    %8 = arith.addi %c0_i32, %c200_i32 : i32
    %c1_i32 = arith.constant 1 : i32
    %9:2 = scf.for %arg3 = %c0_i32 to %8 step %c1_i32 iter_args(%arg4 = %6, %arg5 = %7) -> (vector<8x1xf32>, vector<1x16xf32>)  : i32 {
      %cst_11 = arith.constant 2.000000e+01 : f32
      %23 = vector.broadcast %cst_11 : f32 to vector<1x16xf32>
      %24 = arith.mulf %arg5, %23 : vector<1x16xf32>
      %25 = vector.broadcast %24 : vector<1x16xf32> to vector<8x16xf32>
      %26 = arith.subf %25, %2 : vector<8x16xf32>
      %cst_12 = arith.constant dense<0xFF800000> : vector<8xf32>
      %27 = vector.multi_reduction <maximumf>, %26, %cst_12 [1] : vector<8x16xf32> to vector<8xf32>
      %28 = vector.shape_cast %27 : vector<8xf32> to vector<8x1xf32>
      %29 = vector.broadcast %28 : vector<8x1xf32> to vector<8x16xf32>
      %30 = arith.subf %26, %29 : vector<8x16xf32>
      %31 = math.exp %30 : vector<8x16xf32>
      %cst_13 = arith.constant dense<0.000000e+00> : vector<8xf32>
      %32 = vector.multi_reduction <add>, %31, %cst_13 [1] : vector<8x16xf32> to vector<8xf32>
      %33 = vector.shape_cast %32 : vector<8xf32> to vector<8x1xf32>
      %34 = math.log %33 : vector<8x1xf32>
      %35 = arith.addf %28, %34 : vector<8x1xf32>
      %36 = arith.subf %5, %35 : vector<8x1xf32>
      %cst_14 = arith.constant 5.000000e-02 : f32
      %37 = vector.broadcast %cst_14 : f32 to vector<8x1xf32>
      %38 = arith.mulf %37, %36 : vector<8x1xf32>
      %cst_15 = arith.constant 2.000000e+01 : f32
      %39 = vector.broadcast %cst_15 : f32 to vector<8x1xf32>
      %40 = arith.mulf %38, %39 : vector<8x1xf32>
      %41 = vector.broadcast %40 : vector<8x1xf32> to vector<8x16xf32>
      %42 = arith.subf %41, %2 : vector<8x16xf32>
      %cst_16 = arith.constant dense<0xFF800000> : vector<16xf32>
      %43 = vector.multi_reduction <maximumf>, %42, %cst_16 [0] : vector<8x16xf32> to vector<16xf32>
      %44 = vector.shape_cast %43 : vector<16xf32> to vector<1x16xf32>
      %45 = vector.broadcast %44 : vector<1x16xf32> to vector<8x16xf32>
      %46 = arith.subf %42, %45 : vector<8x16xf32>
      %47 = math.exp %46 : vector<8x16xf32>
      %cst_17 = arith.constant dense<0.000000e+00> : vector<16xf32>
      %48 = vector.multi_reduction <add>, %47, %cst_17 [0] : vector<8x16xf32> to vector<16xf32>
      %49 = vector.shape_cast %48 : vector<16xf32> to vector<1x16xf32>
      %50 = math.log %49 : vector<1x16xf32>
      %51 = arith.addf %44, %50 : vector<1x16xf32>
      %52 = arith.subf %4, %51 : vector<1x16xf32>
      %cst_18 = arith.constant 5.000000e-02 : f32
      %53 = vector.broadcast %cst_18 : f32 to vector<1x16xf32>
      %54 = arith.mulf %53, %52 : vector<1x16xf32>
      scf.yield %38, %54 : vector<8x1xf32>, vector<1x16xf32>
    }
    %10 = vector.broadcast %9#0 : vector<8x1xf32> to vector<8x16xf32>
    %11 = vector.broadcast %9#1 : vector<1x16xf32> to vector<8x16xf32>
    %12 = arith.addf %10, %11 : vector<8x16xf32>
    %cst_6 = arith.constant 2.000000e+01 : f32
    %13 = vector.broadcast %cst_6 : f32 to vector<8x16xf32>
    %14 = arith.mulf %12, %13 : vector<8x16xf32>
    %15 = arith.subf %14, %2 : vector<8x16xf32>
    %16 = math.exp %15 : vector<8x16xf32>
    %17 = arith.mulf %16, %0 : vector<8x16xf32>
    %cst_7 = arith.constant dense<0.000000e+00> : vector<8xf32>
    %18 = vector.multi_reduction <add>, %17, %cst_7 [1] : vector<8x16xf32> to vector<8xf32>
    %19 = vector.shape_cast %18 : vector<8xf32> to vector<8x1xf32>
    %cst_8 = arith.constant dense<0.000000e+00> : vector<1xf32>
    %20 = vector.multi_reduction <add>, %19, %cst_8 [0] : vector<8x1xf32> to vector<1xf32>
    %21 = vector.shape_cast %20 : vector<1xf32> to vector<1x1xf32>
    %c0_9 = arith.constant 0 : index
    %c0_10 = arith.constant 0 : index
    %22 = vector.load %arg2[%c0_9, %c0_10] : memref<1x1xf32, #tpu.memory_space<vmem>>, vector<1x1xf32>
    tpu.vector_store %arg2[%c0_9, %c0_10], %21 {strides = array<i32>} : memref<1x1xf32, #tpu.memory_space<vmem>>, vector<1x1xf32>,
    return
  }
}

</mosaic_0001>

<bundles_post_ra>
// kernel: prototype_forward.3
= control target key start
LH: loop header
LB: loop body
LE: loop exit
PB: predicated region body
PF: predicated region fallthrough
CT: control target
= control target key end

     0   :  { %7 = vsyncpa [#allocation3], 0  ;;  %v182_v5 = vmov 0.0   ;;  %s217_s13 = smov 0   ;;  %s246_s0 = inlined_call_operand.vmem [shape: f32[8,16], index: 0, kind: input, shape index: {}]   ;;  %s247_s1 = inlined_call_operand.vmem [shape: f32[1,16], index: 1, kind: input, shape index: {}]   ;;  %s248_s2 = inlined_call_operand.hbm [shape: f32[1,1], index: 2, kind: output, shape index: {}]  }
   0x1   :  { %v209_v0 = vld [vmem:[%s246_s0] sm:$0xff] }
   0x2   :  { %v14_v1 = vld [vmem:[%s247_s1] sm:$0x1]  ;;  %v215_v2 = vmul.f32 20.0, %v209_v0 }
   0x3   :  { %138 = vlog2.f32 %v14_v1 }
   0xd   :  { %v139_v3 = vpop.eup %138 }
   0xe   :  { %v16_v4 = vmul.f32 0.6931472, %v139_v3 }
   0xf LB: > { %v27_v6 = vlaneseq  ;;  %v25_v7 = vmul.f32 20.0, %v184_v5  ;;  %vm33_vm0 = vcmask 130048   ;;  %s22_s13 = sadd.s32 1, %s188_s13   ;;  %s188_s13 = sphi %s217_s13, %s22_s13   ;;  %v184_v5 = vphi %v182_v5, %v183_v5  }
  0x10   : > { %p19_p0 = scmp.ge.s32.totalorder %s22_s13, 200  }
  0x11   : > { %v28_v8 = vshrl.u32 %v27_v6, 7  ;;  %s190_s0 = smov (%p19_p0), [#allocation2]   ;;  %vm94_vm1 = vcmask (%p19_p0), 0  }
  0x12   :  { %s102_s1 = sshll.u32 (%p19_p0), %s190_s0, 4  ;;  %s103_s1 = int_to_ptr.vmem [resolvable:$true] %s102_s1 }
  0x13   : > { %v29_v9 = vsub.s32 0, %v28_v8  ;;  %s150_s14 = scalar_lea.vmem (%p19_p0), %s103_s1, 16  ;;  %s154_s15 = scalar_lea.vmem (%p19_p0), %s103_s1, 32 }
  0x14   :  { %p151_p1 = scmp.ne.s32.totalorder (%p19_p0), %s103_s1, %s150_s14  ;;  %p155_p2 = scmp.lt.s32.totalorder (%p19_p0), %s103_s1, %s103_s1 }
  0x15   : > { %v30_v10 = vrot.slane %v25_v7, %v29_v9  ;;  %p156_p3 = scmp.lt.s32.totalorder (%p19_p0), %s154_s15, %s150_s14 }
  0x17   : > { %v32_v11 = vsub.f32 %v30_v10, %v215_v2  ;;  %p157_p4 = por (%p19_p0), %p156_p3, %p155_p2 }
  0x19   : > { %v34_v12 = vsel %vm33_vm0, %v32_v11, -inf  ;;  %p158_p5 = pnand (%p19_p0), %p157_p4, %p151_p1 }
  0x1a   : > { %35 = vmax.xlane.f32.xlu0 %v34_v12 }
  0xa7   : > { %v36_v13 = vpop.xlane.xlu0 %35 }
  0xa8   : > { %v37_v14 = vsub.f32 %v32_v11, %v36_v13 }
  0xaa   : > { %v38_v15 = vmul.f32 1.442695, %v37_v14 }
  0xac   : > { %140 = vpow2.f32 %v38_v15 }
  0xb6   : > { %v141_v16 = vpop.eup %140 }
  0xb7   : > { %v40_v17 = vsel %vm33_vm0, %v141_v16, 0.0 }
  0xb8   : > { %41 = vadd.xlane.f32.xlu0 %v40_v17 }
 0x145   : > { %v42_v18 = vpop.xlane.xlu0 %41 }
 0x146   : > { %142 = vlog2.f32 %v42_v18 }
 0x150   : > { %v143_v19 = vpop.eup %142 }
 0x151   : > { %v44_v20 = vmul.f32 0.6931472, %v143_v19 }
 0x153   : > { %v45_v21 = vadd.f32 %v44_v20, %v36_v13 }
 0x155   : > { %v46_v22 = vsub.f32 -2.0794415, %v45_v21 }
 0x157   : > { %v47_v23 = vmul.f32 0.05, %v46_v22 }
 0x159   : > { %v48_v24 = vmul.f32 20.0, %v47_v23 }
 0x15b   : > { %v49_v25 = vsub.f32 %v48_v24, %v215_v2 }
 0x15d   : > { %v50_v26 = vsel %vm33_vm0, %v49_v25, -inf }
 0x15e   : > { %v51_v27 = vrot.slane %v50_v26, 4 }
 0x160   : > { %v52_v28 = vmax.f32 %v50_v26, %v51_v27 }
 0x162   : > { %v53_v29 = vrot.slane %v52_v28, 2 }
 0x164   : > { %v54_v30 = vmax.f32 %v52_v28, %v53_v29 }
 0x166   : > { %v55_v31 = vrot.slane %v54_v30, 1 }
 0x168   : > { %v56_v32 = vmax.f32 %v54_v30, %v55_v31 }
 0x16a   : > { %v57_v33 = vsub.f32 %v49_v25, %v56_v32 }
 0x16c   : > { %v58_v34 = vmul.f32 1.442695, %v57_v33 }
 0x16e   : > { %144 = vpow2.f32 %v58_v34 }
 0x178   : > { %v145_v35 = vpop.eup %144 }
 0x179   : > { %v60_v36 = vsel %vm33_vm0, %v145_v35, 0.0 }
 0x17a   : > { %v61_v37 = vrot.slane %v60_v36, 4 }
 0x17c   : > { %v62_v38 = vadd.f32 %v61_v37, %v60_v36 }
 0x17e   : > { %v63_v39 = vrot.slane %v62_v38, 2 }
 0x180   : > { %v64_v40 = vadd.f32 %v63_v39, %v62_v38 }
 0x182   : > { %v65_v41 = vrot.slane %v64_v40, 1 }
 0x184   : > { %v66_v42 = vadd.f32 %v65_v41, %v64_v40 }
 0x186   : > { %146 = vlog2.f32 %v66_v42 }
 0x190   : > { %v147_v43 = vpop.eup %146 }
 0x191   : > { %v68_v44 = vmul.f32 0.6931472, %v147_v43 }
 0x193   : > { %v69_v45 = vadd.f32 %v68_v44, %v56_v32  ;;  %21 = sbr.rel (!%p19_p0) target bundleno = 15 (0xf), region = 35 }
 0x195   : > { %v70_v46 = vsub.f32 %v16_v4, %v69_v45 }
 0x197   : > { %v71_v47 = vmul.f32 0.05, %v70_v46  }
 0x199   : > { %v183_v5 = vmov %v71_v47   ;;  %v76_v48 = vrot.slane (%p19_p0), %v71_v47, %v29_v9 }
 0x19b   :  { %v78_v49 = vadd.f32 %v76_v48, %v47_v23 }
 0x19d   :  { %v79_v50 = vmul.f32 20.0, %v78_v49 }
 0x19f   :  { %v80_v51 = vsub.f32 %v79_v50, %v215_v2 }
 0x1a1   :  { %v81_v52 = vmul.f32 1.442695, %v80_v51 }
 0x1a3   :  { %148 = vpow2.f32 %v81_v52 }
 0x1ad   :  { %v149_v53 = vpop.eup %148 }
 0x1ae   :  { %v83_v54 = vmul.f32 %v149_v53, %v209_v0 }
 0x1b0   :  { %v85_v55 = vsel %vm33_vm0, %v83_v54, 0.0 }
 0x1b1   :  { %86 = vadd.xlane.f32.xlu0 %v85_v55 }
 0x23e   :  { %v87_v56 = vpop.xlane.xlu0 %86 }
 0x23f   :  { %v88_v57 = vrot.slane %v87_v56, 4 }
 0x241   :  { %v89_v58 = vadd.f32 %v88_v57, %v87_v56 }
 0x243   :  { %v90_v59 = vrot.slane %v89_v58, 2 }
 0x245   :  { %v91_v60 = vadd.f32 %v90_v59, %v89_v58 }
 0x247   :  { %v92_v61 = vrot.slane %v91_v60, 1 }
 0x249   :  { %v93_v62 = vadd.f32 %v92_v61, %v91_v60 }
 0x24b   :  { %95 = vst.msk [vmem:[#allocation2] sm:$0x1] %vm94_vm1, %v93_v62 }
 0x24c   :  { %161 = shalt.err (!%p158_p5)
}
 0x24d   :  { %s162_s18 = scalar_lea.hbm %s248_s2, 16 }
 0x24e   :  { %p163_p6 = scmp.ne.s32.totalorder %s248_s2, %s162_s18  ;;  %p166_p7 = scmp.lt.u32.totalorder %s162_s18, %s248_s2 }
 0x250   :  { %p168_p8 = pnand %p166_p7, %p163_p6 }
 0x252   :  { %171 = shalt.err (!%p168_p8)
}
 0x253   :  { %105 = dma.vmem_to_hbm [thread:$0]  %s103_s1, 16, %s248_s2, [#allocation3]  }
 0x254   :  { %180 = dma.done.wait [#allocation3], 16  }
 0x255   :  { %181 = vsyncadd [#allocation3], 4294967280 }
 0x256   :  { %109 = vsyncpa [#allocation3], 1 }

// kernel: prototype_forward.2
= control target key start
LH: loop header
LB: loop body
LE: loop exit
PB: predicated region body
PF: predicated region fallthrough
CT: control target
= control target key end

     0   :  { %10 = vsyncpa [#allocation3], 0  ;;  %s433_s0 = inlined_call_operand.hbm [shape: f32[8,128], index: 0, kind: input, shape index: {}]   ;;  %s434_s1 = inlined_call_operand.hbm [shape: f32[16,128], index: 1, kind: input, shape index: {}]   ;;  %s435_s2 = inlined_call_operand.vmem [shape: f32[8,16], index: 2, kind: output, shape index: {0}]   ;;  %s436_s3 = inlined_call_operand.vmem [shape: s32[8,1], index: 3, kind: output, shape index: {1}]   ;;  %s437_s4 = inlined_call_operand.hbm [shape: f32[8,16], index: 4, kind: output, shape index: {2}]  }
   0x1   :  { %11 = vsyncpa [#allocation6], 0 }
   0x2   :  { %12 = vsyncpa [#allocation4], 0  ;;  %s344_s15 = smov [#allocation2]   ;;  %s345_s17 = smov [#allocation5]  }
   0x3   :  { %s19_s16 = sshll.u32 %s344_s15, 4  ;;  %s28_s18 = sshll.u32 %s345_s17, 4  ;;  %s20_s16 = int_to_ptr.vmem [resolvable:$true] %s19_s16  ;;  %s378_s18 = int_to_ptr.vmem [resolvable:$true] %s28_s18 }
   0x4   :  { %s272_s21 = scalar_lea.hbm %s433_s0, 128 }
   0x5   :  { %p273_p0 = scmp.ne.s32.totalorder %s433_s0, %s272_s21  ;;  %p276_p1 = scmp.lt.u32.totalorder %s272_s21, %s433_s0 }
   0x7   :  { %p278_p2 = pnand %p276_p1, %p273_p0 }
   0x9   :  { %281 = shalt.err (!%p278_p2)
}
   0xa   :  { %s282_s26 = scalar_lea.vmem %s20_s16, 128  ;;  %p287_p4 = scmp.lt.s32.totalorder %s20_s16, %s20_s16 }
   0xb   :  { %p283_p3 = scmp.ne.s32.totalorder %s20_s16, %s282_s26  ;;  %p288_p5 = scmp.lt.s32.totalorder %s282_s26, %s282_s26 }
   0xd   :  { %p289_p6 = por %p288_p5, %p287_p4 }
   0xf   :  { %p290_p7 = pnand %p289_p6, %p283_p3 }
  0x11   :  { %293 = shalt.err (!%p290_p7)
}
  0x12   :  { %22 = dma.hbm_to_vmem [thread:$0]  %s433_s0, 128, %s20_s16, [#allocation3]  }
  0x13   :  { %s294_s5 = scalar_lea.hbm %s434_s1, 256 }
  0x14   :  { %p295_p8 = scmp.ne.s32.totalorder %s434_s1, %s294_s5  ;;  %p298_p9 = scmp.lt.u32.totalorder %s294_s5, %s434_s1 }
  0x16   :  { %p300_p10 = pnand %p298_p9, %p295_p8 }
  0x18   :  { %303 = shalt.err (!%p300_p10)
}
  0x19   :  { %s304_s10 = scalar_lea.vmem %s378_s18, 256  ;;  %p309_p12 = scmp.lt.s32.totalorder %s378_s18, %s378_s18 }
  0x1a   :  { %p305_p11 = scmp.ne.s32.totalorder %s378_s18, %s304_s10  ;;  %p310_p13 = scmp.lt.s32.totalorder %s304_s10, %s304_s10 }
  0x1c   :  { %p311_p0 = por %p310_p13, %p309_p12 }
  0x1e   :  { %p312_p1 = pnand %p311_p0, %p305_p11 }
  0x20   :  { %315 = shalt.err (!%p312_p1)
}
  0x21   :  { %s346_s0 = smov 128   ;;  %s347_s11 = smov 8  }
  0x22   :  { %34 = dma.hbm_to_vmem [thread:$0]  %s434_s1, 256, %s378_s18, [#allocation6], %s346_s0, %s346_s0, %s347_s11  }
  0x23   :  { %338 = dma.done.wait [#allocation3], 128  }
  0x24   :  { %339 = vsyncadd [#allocation3], 4294967168 }
  0x25   :  { %340 = dma.done.wait [#allocation6], 256  }
  0x26   :  { %341 = vsyncadd [#allocation6], 4294967040  ;;  %v348_v0 = vmov 0.0   ;;  %v349_v1 = vmov 0.0|0.0   ;;  %vm350_vm0 = vmmov 0   ;;  %v43_v2 = vld [vmem:[#allocation5] sm:$0xff]  ;;  %v166_v22 = vlaneseq }
  0x27   :  { %239 = vmatprep.subr.bf16.mxu0 %v348_v0  ;;  %252 = vmatprep.subr.bf16.mxu1 %v349_v1  ;;  %v44_v3 = vld [vmem:[#allocation5 + $0x8] sm:$0xff]  ;;  %v92_v5 = vmul.f32 %v43_v2, %v43_v2  ;;  %v42_v7 = vld [vmem:[#allocation2] sm:$0xff]  ;;  %v351_v11 = vmov 1.0   ;;  %vm172_vm1 = vcmask 130048  }
  0x28   :  { %241 = vmatprep.mubr.msk.bf16.mxu0 %vm350_vm0, %v348_v0  ;;  %249 = vmatprep.mubr.msk.f32.mxu1 %vm350_vm0, %v348_v0  ;;  %v46_v4 = vpack.c.bf16 %v44_v3, %v43_v2  ;;  %v93_v6 = vmul.f32 %v44_v3, %v44_v3  ;;  %v87_v8 = vmul.f32 %v42_v7, %v42_v7  ;;  %v167_v23 = vshrl.u32 %v166_v22, 7 }
  0x29   :  { %v45_v10 = vpack.c.bf16 %v42_v7, %v42_v7  ;;  %v175_v37 = vand.u32 127, %v166_v22 }
  0x2a   :  { %240 = vmatpush3.bf16.xpose.msra.mxu0 %v46_v4  ;;  %v253_v9 = vpack.c.bf16 %v93_v6, %v92_v5  ;;  %88 = vadd.xlane.f32.xlu0 %v87_v8  ;;  %v168_v25 = vsub.s32 0, %v167_v23 }
  0x2c   :  { %254 = vmatpush3.bf16.xpose.msra.mxu1 %v253_v9 }
  0x31   :  { %242 = vmatmul.mubr.bf16.vlgmr.msra.gmra.mrb[0].mxu0 %v45_v10 }
  0x33   :  { %250 = vmatmul.mubr.f32.vlgmr.msra.gmra.mrb[0].mxu1 %v351_v11 }
  0xb7   :  { %v89_v12 = vpop.xlane.xlu0 %88 }
  0xb8   :  { %v90_v13 = vadd.f32 1e-24, %v89_v12 }
  0xba   :  { %264 = vrsqrt.f32 %v90_v13 }
  0xc4   :  { %v265_v24 = vpop.eup %264 }
 0x104   :  { %v81_v14 = vpop.f32.mrb[0].mxu0 }
 0x105   :  { %v198_v15 = vsel %vm172_vm1, %v81_v14, -inf  ;;  %v243_v16 = vpop.f32.mrb[1].mxu0  ;;  %v165_v26 = vmul.f32 %v265_v24, %v81_v14 }
 0x106   :  { %v160_v17 = vpop.f32.mrb[0].mxu1  ;;  %199 = vmax.xlane.f32.xlu1 %v198_v15  ;;  %v84_v18 = vpop.f32.mrb[2].mxu0 }
 0x107   :  { %v161_v19 = vadd.f32 1e-24, %v160_v17  ;;  %v251_v20 = vpop.f32.mrb[1].mxu1  ;;  %v244_v21 = vpop.f32.mrb[3].mxu0 }
 0x109   :  { %266 = vrsqrt.f32 %v161_v19 }
 0x113   :  { %v267_v27 = vpop.eup %266 }
 0x114   :  { %v169_v28 = vrot.slane %v267_v27, %v168_v25 }
 0x116   :  { %v170_v29 = vmul.f32 %v169_v28, %v165_v26 }
 0x118   :  { %v171_v30 = vsub.f32 1.0, %v170_v29 }
 0x11a   :  { %v176_v31 = vsel %vm172_vm1, %v171_v30, inf  ;;  %173 = vst.msk [vmem:[%s435_s2] sm:$0xff] %vm172_vm1, %v171_v30  ;;  %s352_s2 = smov [#allocation7]  }
 0x11b   :  { %177 = vmin.xlane.f32.xlu0 %v176_v31  ;;  %s220_s15 = sshll.u32 %s352_s2, 4  ;;  %s221_s15 = int_to_ptr.vmem [resolvable:$true] %s220_s15 }
 0x11c   :  { %s316_s16 = scalar_lea.vmem %s221_s15, 128  ;;  %p321_p3 = scmp.lt.s32.totalorder %s221_s15, %s221_s15 }
 0x11d   :  { %p317_p2 = scmp.ne.s32.totalorder %s221_s15, %s316_s16  ;;  %p322_p4 = scmp.lt.s32.totalorder %s316_s16, %s316_s16 }
 0x11f   :  { %p323_p5 = por %p322_p4, %p321_p3 }
 0x121   :  { %p324_p6 = pnand %p323_p5, %p317_p2 }
 0x193   :  { %v200_v32 = vpop.xlane.xlu1 %199 }
 0x194   :  { %v201_v33 = vsub.f32 %v81_v14, %v200_v32 }
 0x196   :  { %v202_v34 = vmul.f32 1.442695, %v201_v33 }
 0x198   :  { %268 = vpow2.f32 %v202_v34 }
 0x1a2   :  { %v269_v35 = vpop.eup %268 }
 0x1a3   :  { %v204_v36 = vsel %vm172_vm1, %v269_v35, 0.0 }
 0x1a4   :  { %205 = vadd.xlane.f32.xlu0 %v204_v36 }
 0x1a8   :  { %v178_v38 = vpop.xlane.xlu0 %177 }
 0x1a9   :  { %vm179_vm2 = vcmp.eq.f32.partialorder %v171_v30, %v178_v38 }
 0x1aa   :  { %v180_v39 = vsel %vm179_vm2, %v175_v37, 16 }
 0x1ab   :  { %v181_v40 = vsel %vm172_vm1, %v180_v39, 2147483647 }
 0x1ac   :  { %v183_v41 = vshra.s32 %v181_v40, 16  ;;  %v182_v44 = vand.u32 65535, %v181_v40 }
 0x1ae   :  { %v185_v42 = vcvt.s32.f32 %v183_v41  ;;  %v184_v47 = vcvt.s32.f32 %v182_v44 }
 0x1b0   :  { %186 = vmin.xlane.f32.xlu1 %v185_v42 }
 0x231   :  { %v206_v43 = vpop.xlane.xlu0 %205 }
 0x232   :  { %270 = vrcp.f32 %v206_v43 }
 0x23c   :  { %v271_v45 = vpop.eup %270 }
 0x23d   :  { %v187_v46 = vpop.xlane.xlu1 %186  ;;  %v208_v48 = vmul.f32 %v271_v45, %v269_v35 }
 0x23e   :  { %vm188_vm3 = vcmp.eq.f32.partialorder %v185_v42, %v187_v46 }
 0x23f   :  { %v189_v49 = vsel %vm188_vm3, %v184_v47, inf  ;;  %209 = vst.msk [vmem:[#allocation7] sm:$0xff] %vm172_vm1, %v208_v48 }
 0x240   :  { %190 = vmin.xlane.f32.xlu1 %v189_v49 }
 0x241   :  { %327 = shalt.err (!%p324_p6)
}
 0x242   :  { %s328_s19 = scalar_lea.hbm %s437_s4, 128 }
 0x243   :  { %p329_p7 = scmp.ne.s32.totalorder %s437_s4, %s328_s19  ;;  %p332_p8 = scmp.lt.u32.totalorder %s328_s19, %s437_s4 }
 0x245   :  { %p334_p9 = pnand %p332_p8, %p329_p7 }
 0x247   :  { %337 = shalt.err (!%p334_p9)
}
 0x248   :  { %223 = dma.vmem_to_hbm [thread:$0]  %s221_s15, 128, %s437_s4, [#allocation4]   ;;  %v193_v50 = vcvt.f32.s32 %v187_v46  ;;  %vm196_vm4 = vcmask 7168  }
 0x24a   :  { %v194_v52 = vshll.u32 %v193_v50, 16 }
 0x2cd   :  { %v191_v51 = vpop.xlane.xlu1 %190 }
 0x2ce   :  { %v192_v53 = vcvt.f32.s32 %v191_v51 }
 0x2d0   :  { %v195_v54 = vadd.s32 %v194_v52, %v192_v53 }
 0x2d2   :  { %197 = vst.msk [vmem:[%s436_s3] sm:$0xff] %vm196_vm4, %v195_v54 }
 0x2d3   :  { %342 = dma.done.wait [#allocation4], 128  }
 0x2d4   :  { %343 = vsyncadd [#allocation4], 4294967168 }
 0x2d5   :  { %231 = vsyncpa [#allocation3], 1 }
 0x2d6   :  { %232 = vsyncpa [#allocation6], 1 }
 0x2d7   :  { %233 = vsyncpa [#allocation4], 1 }

</bundles_post_ra>
